<compile_context>
chip_gen: v7x
topology: tpu7x:2x2x1
jax: 0.10.0
libtpu: 0.0.40
codegen_flags: <defaults>
</compile_context>

<pallas_src>
import jax
import jax.numpy as jnp
from jax import lax
from jax.experimental import pallas as pl
from jax.experimental.pallas import tpu as pltpu

_MARGIN = 128  # lane-aligned halo strip width on each side of the per-tile window


def _hetconv_kernel(x_ref, w_ref, o_ref, xh_ref):
    # x_ref : (1, C_in, L_pad)              full-length slab (resident per batch element)
    # w_ref : (C_out, K*C_in)               fused weight (pwc folded into centre tap), resident
    # o_ref : (1, C_out, L_tile)            lane-dense output tile
    # xh_ref: (C_in, L_tile + 2*_MARGIN)    per-tile halo window (VMEM scratch)
    C_in = x_ref.shape[1]
    L_tile = o_ref.shape[2]
    K = w_ref.shape[1] // C_in
    pad = (K - 1) // 2

    l = pl.program_id(1)
    n_l = pl.num_programs(1)
    base = pl.multiple_of(l * L_tile, 128)

    # Interior: aligned copy of this tile's columns into the halo window.
    xh_ref[:, _MARGIN:_MARGIN + L_tile] = x_ref[0, :, pl.ds(base, L_tile)]

    # Left halo strip (aligned 128-wide write; only its last `pad` columns are read).
    @pl.when(l == 0)
    def _():
        xh_ref[:, :_MARGIN] = jnp.zeros((C_in, _MARGIN), xh_ref.dtype)

    @pl.when(l > 0)
    def _():
        left = pl.multiple_of(base - _MARGIN, 128)
        xh_ref[:, :_MARGIN] = x_ref[0, :, pl.ds(left, _MARGIN)]

    # Right halo strip (only its first `pad` columns are read).
    @pl.when(l == n_l - 1)
    def _():
        xh_ref[:, _MARGIN + L_tile:] = jnp.zeros((C_in, _MARGIN), xh_ref.dtype)

    @pl.when(l < n_l - 1)
    def _():
        right = pl.multiple_of(base + L_tile, 128)
        xh_ref[:, _MARGIN + L_tile:] = x_ref[0, :, pl.ds(right, _MARGIN)]

    # Tap k covers halo columns [_MARGIN - pad + k, _MARGIN - pad + k + L_tile).
    def tap(k):
        s = _MARGIN - pad + k
        return xh_ref[:, s:s + L_tile]

    if C_in < 128:
        # Small channel counts: fuse the K taps into ONE MXU contraction over
        # K*C_in instead of K nearly-empty dots.
        # TODO(synk): for tiny C_out/C_in (MXU <4% filled on v6e/v7x), process
        # several batch elements / L-tiles per grid step to amortize the weight push.
        x_stack = jnp.concatenate([tap(k) for k in range(K)], axis=0)   # (K*C_in, L_tile)
        acc = jnp.dot(w_ref[...], x_stack, preferred_element_type=jnp.float32)
    else:
        # Wide channels: each per-tap dot already fills the MXU; skip the K-fold
        # im2col duplication and accumulate K dots instead.
        acc = jnp.zeros((o_ref.shape[1], L_tile), jnp.float32)
        for k in range(K):
            acc = acc + jnp.dot(w_ref[:, k * C_in:(k + 1) * C_in], tap(k),
                                preferred_element_type=jnp.float32)

    o_ref[0] = acc.astype(o_ref.dtype)


def _round_up(v, m):
    return -(-v // m) * m


def _pick_l_tile(l_pad, cap=512):
    # Largest multiple-of-128 tile (<= cap) that divides the padded length.
    best = 128
    for t in range(128, min(l_pad, cap) + 1, 128):
        if l_pad % t == 0:
            best = t
    return best


def hetconv1d(x, w_gwc, w_pwc, *, groups, padding):
    """x: (N, C_in, L); w_gwc: (C_out, C_in // groups, K); w_pwc: (C_out, C_in, 1)."""
    N, C_in, L = x.shape
    C_out, c_per_group, K = w_gwc.shape
    assert C_in % groups == 0 and c_per_group == C_in // groups
    assert C_out % groups == 0
    assert w_pwc.shape == (C_out, C_in, 1)
    assert 2 * padding == K - 1, "gwc and pwc outputs must have equal length"
    assert K - 1 <= 2 * _MARGIN

    # --- host-side weight fusion (one-time glue on small weight tensors) ---
    # Expand the grouped weight to a block-diagonal full-channel matrix and fold
    # the 1x1 pointwise weight into the centre tap: HetConv == one dense conv1d.
    # TODO(synk): for large groups/C_in (MXU-bound on v5e), keep per-group
    # contractions instead of the zero-expanded weight to avoid FLOP inflation.
    opg = C_out // groups
    wg_full = jnp.zeros((C_out, C_in, K), dtype=w_gwc.dtype)
    for g in range(groups):
        wg_full = wg_full.at[
            g * opg:(g + 1) * opg,
            g * c_per_group:(g + 1) * c_per_group,
            :,
        ].set(w_gwc[g * opg:(g + 1) * opg])
    w_comb = wg_full.at[:, :, padding].add(w_pwc[:, :, 0])

    # --- host-side padding to hardware-friendly sizes ---
    C_in_p = _round_up(C_in, 8)    # sublane packing (f32)
    C_out_p = _round_up(C_out, 8)
    L_pad = _round_up(L, 128)      # lane-dense tiles
    x_p = x
    if (C_in_p, L_pad) != (C_in, L):
        x_p = jnp.pad(x, ((0, 0), (0, C_in_p - C_in), (0, L_pad - L)))
    if (C_out_p, C_in_p) != (C_out, C_in):
        w_comb = jnp.pad(w_comb, ((0, C_out_p - C_out), (0, C_in_p - C_in), (0, 0)))

    # Fused layout (C_out, K*C_in): tap index major inside the contraction,
    # matching the tap stacking / per-tap weight slices in the kernel.
    w_fused = jnp.transpose(w_comb, (0, 2, 1)).reshape(C_out_p, K * C_in_p)
    # TODO(synk): optionally cast x_p / w_fused to bfloat16 (keeping f32 accumulation)
    # to halve HBM/VMEM traffic when the model tolerates it.

    l_tile = _pick_l_tile(L_pad)
    n_l = L_pad // l_tile

    # VMEM budget derived from the actual (layout-padded, double-buffered) buffers.
    def _buf_bytes(*dims, itemsize=4):
        d = list(dims)
        d[-1] = _round_up(d[-1], 128)
        if len(d) >= 2:
            d[-2] = _round_up(d[-2], 8)
        n = 1
        for v in d:
            n *= v
        return n * itemsize

    vmem_needed = (2 * _buf_bytes(1, C_in_p, L_pad)            # input slab
                   + 2 * _buf_bytes(C_out_p, K * C_in_p)        # fused weight
                   + 2 * _buf_bytes(1, C_out_p, l_tile)         # output tile
                   + _buf_bytes(C_in_p, l_tile + 2 * _MARGIN))  # halo scratch
    vmem_limit = min(max(int(1.25 * vmem_needed) + (2 << 20), 16 << 20), 56 << 20)
    # TODO(synk): for very large C_in*L (v7x 64 MiB VMEM), retile the input over L
    # with a per-tile halo DMA (memory_space=pl.ANY + make_async_copy) so VMEM is
    # O(C_in * L_tile) instead of holding the full-length slab resident.

    out = pl.pallas_call(
        _hetconv_kernel,
        out_shape=jax.ShapeDtypeStruct((N, C_out_p, L_pad), x.dtype),
        grid_spec=pltpu.PrefetchScalarGridSpec(
            num_scalar_prefetch=0,
            grid=(N, n_l),
            in_specs=[
                # Full-length slab, resident across the L axis (fetched once per n).
                pl.BlockSpec((1, C_in_p, L_pad), lambda n, l: (n, 0, 0)),
                # Fused weight, resident across the whole grid.
                pl.BlockSpec((C_out_p, K * C_in_p), lambda n, l: (0, 0)),
            ],
            out_specs=pl.BlockSpec((1, C_out_p, l_tile), lambda n, l: (n, 0, l)),
            scratch_shapes=[pltpu.VMEM((C_in_p, l_tile + 2 * _MARGIN), x.dtype)],
        ),
        compiler_params=pltpu.CompilerParams(
            # No cross-iteration state: both axes are independent (megacore-shardable).
            dimension_semantics=("parallel", "parallel"),
            vmem_limit_bytes=vmem_limit,
        ),
    )(x_p, w_fused)

    return out[:, :C_out, :L]


def _reference(x, w_gwc, w_pwc, *, groups, padding):
    # Pure-JAX reference (XLA convs), used only for a correctness check.
    gwc = lax.conv_general_dilated(
        x, w_gwc, window_strides=(1,), padding=((padding, padding),),
        dimension_numbers=("NCH", "OIH", "NCH"), feature_group_count=groups,
    )
    pwc = lax.conv_general_dilated(
        x, w_pwc, window_strides=(1,), padding=((0, 0),),
        dimension_numbers=("NCH", "OIH", "NCH"),
    )
    return gwc + pwc


if __name__ == "__main__":
    # Small shapes consistent with the module's forward pass; L = 640 = 5 x 128 so the
    # kernel exercises left-boundary, interior, and right-boundary L-tiles.
    N, C_in, C_out, L = 2, 8, 8, 640
    K, PAD, GROUPS = 5, 2, 4

    key = jax.random.PRNGKey(0)
    kx, kg, kp = jax.random.split(key, 3)
    x = jax.random.normal(kx, (N, C_in, L), dtype=jnp.float32)
    w_gwc = 0.1 * jax.random.normal(kg, (C_out, C_in // GROUPS, K), dtype=jnp.float32)
    w_pwc = 0.1 * jax.random.normal(kp, (C_out, C_in, 1), dtype=jnp.float32)

    out = hetconv1d(x, w_gwc, w_pwc, groups=GROUPS, padding=PAD)
    out = jax.block_until_ready(out)

    ref = _reference(x, w_gwc, w_pwc, groups=GROUPS, padding=PAD)
    assert out.shape == (N, C_out, L)
    assert jnp.allclose(out, ref, atol=1e-5, rtol=1e-5)

    print("KERNEL_OK")
</pallas_src>

<mosaic_0001>
module attributes {stable_mosaic.version = 11 : i64} {
  func.func @_hetconv_kernel(%arg0: i32, %arg1: i32, %arg2: memref<1x8x640xf32, #tpu.memory_space<vmem>>, %arg3: memref<8x40xf32, #tpu.memory_space<vmem>>, %arg4: memref<1x8x128xf32, #tpu.memory_space<vmem>>, %arg5: memref<8x384xf32, #tpu.memory_space<vmem>>) attributes {dimension_semantics = [#tpu.dimension_semantics<parallel>, #tpu.dimension_semantics<parallel>], iteration_bounds = array<i64: 2, 5>, scalar_prefetch = 0 : i64, scratch_operands = 1 : i64, tpu.core_type = #tpu.core_type<tc>, window_params = [{transform_indices = @transform_0, window_bounds = array<i64: 1, 8, 640>}, {pipeline_mode = #tpu.pipeline_mode<synchronous>, transform_indices = @transform_1, window_bounds = array<i64: 8, 40>}, {transform_indices = @transform_2, window_bounds = array<i64: 1, 8, 128>}]} {
    %c128_i32 = arith.constant 128 : i32
    %0 = arith.muli %arg1, %c128_i32 : i32
    %1 = tpu.assume_multiple %0, 128 : i32
    %c0 = arith.constant 0 : index
    %c0_0 = arith.constant 0 : index
    %2 = arith.index_cast %1 : i32 to index
    %3 = vector.load %arg2[%c0, %c0_0, %2] : memref<1x8x640xf32, #tpu.memory_space<vmem>>, vector<1x8x128xf32>
    %4 = vector.shape_cast %3 : vector<1x8x128xf32> to vector<8x128xf32>
    %c0_1 = arith.constant 0 : index
    %c128 = arith.constant 128 : index
    %5 = vector.load %arg5[%c0_1, %c128] : memref<8x384xf32, #tpu.memory_space<vmem>>, vector<8x128xf32>
    tpu.vector_store %arg5[%c0_1, %c128], %4 {strides = array<i32>} : memref<8x384xf32, #tpu.memory_space<vmem>>, vector<8x128xf32>,
    %c0_i32 = arith.constant 0 : i32
    %6 = arith.cmpi eq, %arg1, %c0_i32 : i32
    %7 = arith.extui %6 : i1 to i32
    %c0_i32_2 = arith.constant 0 : i32
    %8 = arith.cmpi ne, %7, %c0_i32_2 : i32
    scf.if %8 {
      %cst_19 = arith.constant 0.000000e+00 : f32
      %29 = vector.broadcast %cst_19 : f32 to vector<8x128xf32>
      %c0_20 = arith.constant 0 : index
      %c0_21 = arith.constant 0 : index
      %30 = vector.load %arg5[%c0_20, %c0_21] : memref<8x384xf32, #tpu.memory_space<vmem>>, vector<8x128xf32>
      tpu.vector_store %arg5[%c0_20, %c0_21], %29 {strides = array<i32>} : memref<8x384xf32, #tpu.memory_space<vmem>>, vector<8x128xf32>,
    } else {
    }
    %c0_i32_3 = arith.constant 0 : i32
    %9 = arith.cmpi sgt, %arg1, %c0_i32_3 : i32
    %10 = arith.extui %9 : i1 to i32
    %c0_i32_4 = arith.constant 0 : i32
    %11 = arith.cmpi ne, %10, %c0_i32_4 : i32
    scf.if %11 {
      %c128_i32_19 = arith.constant 128 : i32
      %29 = arith.subi %1, %c128_i32_19 : i32
      %30 = tpu.assume_multiple %29, 128 : i32
      %c0_20 = arith.constant 0 : index
      %c0_21 = arith.constant 0 : index
      %31 = arith.index_cast %30 : i32 to index
      %32 = vector.load %arg2[%c0_20, %c0_21, %31] : memref<1x8x640xf32, #tpu.memory_space<vmem>>, vector<1x8x128xf32>
      %33 = vector.shape_cast %32 : vector<1x8x128xf32> to vector<8x128xf32>
      %c0_22 = arith.constant 0 : index
      %c0_23 = arith.constant 0 : index
      %34 = vector.load %arg5[%c0_22, %c0_23] : memref<8x384xf32, #tpu.memory_space<vmem>>, vector<8x128xf32>
      tpu.vector_store %arg5[%c0_22, %c0_23], %33 {strides = array<i32>} : memref<8x384xf32, #tpu.memory_space<vmem>>, vector<8x128xf32>,
    } else {
    }
    %c4_i32 = arith.constant 4 : i32
    %12 = arith.cmpi eq, %arg1, %c4_i32 : i32
    %13 = arith.extui %12 : i1 to i32
    %c0_i32_5 = arith.constant 0 : i32
    %14 = arith.cmpi ne, %13, %c0_i32_5 : i32
    scf.if %14 {
      %cst_19 = arith.constant 0.000000e+00 : f32
      %29 = vector.broadcast %cst_19 : f32 to vector<8x128xf32>
      %c0_20 = arith.constant 0 : index
      %c256 = arith.constant 256 : index
      %30 = vector.load %arg5[%c0_20, %c256] : memref<8x384xf32, #tpu.memory_space<vmem>>, vector<8x128xf32>
      tpu.vector_store %arg5[%c0_20, %c256], %29 {strides = array<i32>} : memref<8x384xf32, #tpu.memory_space<vmem>>, vector<8x128xf32>,
    } else {
    }
    %c4_i32_6 = arith.constant 4 : i32
    %15 = arith.cmpi slt, %arg1, %c4_i32_6 : i32
    %16 = arith.extui %15 : i1 to i32
    %c0_i32_7 = arith.constant 0 : i32
    %17 = arith.cmpi ne, %16, %c0_i32_7 : i32
    scf.if %17 {
      %c128_i32_19 = arith.constant 128 : i32
      %29 = arith.addi %1, %c128_i32_19 : i32
      %30 = tpu.assume_multiple %29, 128 : i32
      %c0_20 = arith.constant 0 : index
      %c0_21 = arith.constant 0 : index
      %31 = arith.index_cast %30 : i32 to index
      %32 = vector.load %arg2[%c0_20, %c0_21, %31] : memref<1x8x640xf32, #tpu.memory_space<vmem>>, vector<1x8x128xf32>
      %33 = vector.shape_cast %32 : vector<1x8x128xf32> to vector<8x128xf32>
      %c0_22 = arith.constant 0 : index
      %c256 = arith.constant 256 : index
      %34 = vector.load %arg5[%c0_22, %c256] : memref<8x384xf32, #tpu.memory_space<vmem>>, vector<8x128xf32>
      tpu.vector_store %arg5[%c0_22, %c256], %33 {strides = array<i32>} : memref<8x384xf32, #tpu.memory_space<vmem>>, vector<8x128xf32>,
    } else {
    }
    %c0_8 = arith.constant 0 : index
    %c126 = arith.constant 126 : index
    %18 = vector.load %arg5[%c0_8, %c126] : memref<8x384xf32, #tpu.memory_space<vmem>>, vector<8x128xf32>
    %c0_9 = arith.constant 0 : index
    %c127 = arith.constant 127 : index
    %19 = vector.load %arg5[%c0_9, %c127] : memref<8x384xf32, #tpu.memory_space<vmem>>, vector<8x128xf32>
    %c0_10 = arith.constant 0 : index
    %c128_11 = arith.constant 128 : index
    %20 = vector.load %arg5[%c0_10, %c128_11] : memref<8x384xf32, #tpu.memory_space<vmem>>, vector<8x128xf32>
    %c0_12 = arith.constant 0 : index
    %c129 = arith.constant 129 : index
    %21 = vector.load %arg5[%c0_12, %c129] : memref<8x384xf32, #tpu.memory_space<vmem>>, vector<8x128xf32>
    %c0_13 = arith.constant 0 : index
    %c130 = arith.constant 130 : index
    %22 = vector.load %arg5[%c0_13, %c130] : memref<8x384xf32, #tpu.memory_space<vmem>>, vector<8x128xf32>
    %23 = tpu.concatenate %18, %19, %20, %21, %22 in 0 : vector<8x128xf32>, vector<8x128xf32>, vector<8x128xf32>, vector<8x128xf32>, vector<8x128xf32> -> vector<40x128xf32>
    %c0_14 = arith.constant 0 : index
    %c0_15 = arith.constant 0 : index
    %24 = vector.load %arg3[%c0_14, %c0_15] : memref<8x40xf32, #tpu.memory_space<vmem>>, vector<8x40xf32>
    %cst = arith.constant dense<0.000000e+00> : vector<8x128xf32>
    %25 = tpu.matmul %24, %23, %cst {dimension_numbers = #tpu.dot_dimension_numbers<[1], [0], [0], [1], [0, 0, 1, 1], [], []>} : vector<8x40xf32>, vector<40x128xf32>, vector<8x128xf32> -> vector<8x128xf32>
    %c0_16 = arith.constant 0 : index
    %c0_17 = arith.constant 0 : index
    %c0_18 = arith.constant 0 : index
    %26 = vector.load %arg4[%c0_16, %c0_17, %c0_18] : memref<1x8x128xf32, #tpu.memory_space<vmem>>, vector<1x8x128xf32>
    %27 = vector.shape_cast %26 : vector<1x8x128xf32> to vector<8x128xf32>
    %28 = vector.shape_cast %25 : vector<8x128xf32> to vector<1x8x128xf32>
    tpu.vector_store %arg4[%c0_16, %c0_17, %c0_18], %28 {strides = array<i32>} : memref<1x8x128xf32, #tpu.memory_space<vmem>>, vector<1x8x128xf32>,
    return
  }
  func.func @transform_0(%arg0: i32, %arg1: i32) -> (i32, i32, i32) {
    %c0_i32 = arith.constant 0 : i32
    %c0_i32_0 = arith.constant 0 : i32
    %c0_i32_1 = arith.constant 0 : i32
    return %arg0, %c0_i32, %c0_i32_0 : i32, i32, i32
  }
  func.func @transform_1(%arg0: i32, %arg1: i32) -> (i32, i32) {
    %c0_i32 = arith.constant 0 : i32
    %c0_i32_0 = arith.constant 0 : i32
    %c0_i32_1 = arith.constant 0 : i32
    return %c0_i32, %c0_i32_0 : i32, i32
  }
  func.func @transform_2(%arg0: i32, %arg1: i32) -> (i32, i32, i32) {
    %c0_i32 = arith.constant 0 : i32
    %c0_i32_0 = arith.constant 0 : i32
    return %arg0, %c0_i32, %arg1 : i32, i32, i32
  }
}

</mosaic_0001>

<bundles_post_ra>
// kernel: tpu_custom_call.1
= control target key start
LH: loop header
LB: loop body
LE: loop exit
PB: predicated region body
PF: predicated region fallthrough
CT: control target
= control target key end

     0   :  { %s1175_s0 = inlined_call_operand.hbm [shape: f32[2,8,640], index: 0, kind: input, shape index: {}]   ;;  %s1176_s1 = inlined_call_operand.hbm [shape: f32[8,40], index: 1, kind: input, shape index: {}]   ;;  %s1177_s2 = inlined_call_operand.hbm [shape: f32[2,8,640], index: 2, kind: output, shape index: {}]  }
   0x1   :  { %1187 = sst [smem:[#allocation16_spill]] %s1176_s1 }
   0x2   :  { %7 = vsyncpa [#allocation4], 0 }
   0x3   :  { %9 = vsyncpa [#allocation4 + $0x1], 0 }
   0x4   :  { %10 = vsyncpa [#allocation7], 0 }
   0x5   :  { %11 = vsyncpa [#allocation5], 0 }
   0x6   :  { %13 = vsyncpa [#allocation5 + $0x1], 0  ;;  %s887_s9 = smov 0   ;;  %s889_s10 = smov 0  }
   0x7   :  { %s891_s11 = smov 0   ;;  %s893_s12 = smov 0  }
   0x8   :  { %s895_s13 = smov 0   ;;  %s897_s14 = smov 0  }
   0x9   :  { %s899_s15 = smov 0   ;;  %s901_s16 = smov 0  }
   0xa   :  { %s903_s17 = smov 0   ;;  %s905_s18 = smov 0  }
   0xb   :  { %s907_s19 = smov 0  }
   0xc LB: > { %1188 = sst [smem:[#allocation12_spill]] %s849_s17  ;;  %s473_s20 = sadd.s32 4294967295, %s857_s19   ;;  %s857_s19 = sphi %s907_s19, %s19_s19   ;;  %s853_s18 = sphi %s905_s18, %s1217_s18   ;;  %s849_s17 = sphi %s903_s17, %s1208_s17   ;;  %s845_s16 = sphi %s901_s16, %s1216_s16   ;;  %s841_s15 = sphi %s899_s15, %s1207_s15   ;;  %s837_s14 = sphi %s897_s14, %s1215_s14   ;;  %s833_s13 = sphi %s895_s13, %s1214_s13   ;;  %s829_s12 = sphi %s893_s12, %s1213_s12   ;;  %s825_s11 = sphi %s891_s11, %s1212_s11   ;;  %s821_s10 = sphi %s889_s10, %s1211_s10   ;;  %s817_s9 = sphi %s887_s9, %s1210_s9  }
   0xd   : > { %s474_s21 = sadd.s32 4294967294, %s857_s19   ;;  %p51_p0 = scmp.ne.s32.totalorder %s833_s13, %s829_s12 }
   0xe   : > { %p943_p1 = scmp.eq.s32.totalorder %s473_s20, 0  ;;  %s87_s23 = sadd.s32 1, %s825_s11 }
   0xf   : > { %p97_p2 = scmp.ne.s32.totalorder %s825_s11, %s821_s10  ;;  %p98_p4 = scmp.eq.s32.totalorder %s473_s20, 9 }
  0x10   : > { %s1189_s22 = scalar_select %p943_p1, 1, 0 }
  0x11   : > { %p952_p3 = por %p943_p1, %p51_p0  ;;  %p103_p5 = scmp.ne.s32.totalorder %s821_s10, %s817_s9 }
  0x12   : > { %p104_p6 = scmp.eq.s32.totalorder %s474_s21, 9  ;;  %p958_p7 = por %p98_p4, %p97_p2 }
  0x13   : > { %s1190_s24 = scalar_select %p952_p3, 1, 0 }
  0x14   : > { %s1191_s25 = scalar_select %p958_p7, 1, 0 }
  0x15   : > { %p475_p8 = scmp.ge.s32.totalorder %s857_s19, 1  ;;  %p963_p9 = por %p104_p6, %p103_p5 }
  0x16   : > { %p111_p10 = scmp.lt.s32.totalorder %s857_s19, 11  ;;  %s859_s28 = smov [#allocation6]  }
  0x17   : > { %s1192_s26 = scalar_select %p963_p9, 1, 0 }
  0x18   : > { %p968_p11 = pnand %p475_p8, %p111_p10  ;;  %s124_s29 = sshll.u32 %s859_s28, 4  ;;  %s125_s29 = int_to_ptr.vmem [resolvable:$true] %s124_s29 }
  0x19   : > { %1193 = sst [smem:[#allocation13_spill]] %s1192_s26  ;;  %s28_s3 = sadd.s32 1, %s849_s17 }
  0x1a   : > { %s1194_s27 = scalar_select %p968_p11, 1, 0 }
  0x1b   : > { %p533_p12 = pneg %p968_p11  ;;  %s1196_s1 = sld [smem:[#allocation16_spill]] }
  0x1d   : > { %p976_p13 = pnand %p533_p12, %p943_p1 }
  0x1f   : > { %p675_p2 = pneg %p976_p13 }
  0x21   : > { %s673_s6 = scalar_lea.hbm %s1196_s1, 128 }
  0x22   : > { %p674_p0 = scmp.ne.s32.totalorder %s1196_s1, %s673_s6  ;;  %p680_p6 = scmp.lt.u32.totalorder %s673_s6, %s1196_s1 }
  0x24   : > { %p676_p4 = pnand %p675_p2, %p674_p0 }
  0x26   : > { %p677_p5 = pneg %p676_p4 }
  0x28   : > { %p682_p8 = pnand %p680_p6, %p677_p5 }
  0x2a   : > { %685 = shalt.err (!%p682_p8)
}
  0x2b   : > { %s686_s21 = scalar_lea.vmem %s125_s29, 128  ;;  %p694_p7 = scmp.lt.s32.totalorder %s125_s29, %s125_s29 }
  0x2c   : > { %p687_p10 = scmp.ne.s32.totalorder %s125_s29, %s686_s21  ;;  %p695_p1 = scmp.lt.s32.totalorder %s686_s21, %s686_s21 }
  0x2e   : > { %p689_p12 = pnand %p687_p10, %p675_p2  ;;  %p696_p3 = por %p695_p1, %p694_p7 }
  0x30   : > { %p690_p9 = pneg %p689_p12 }
  0x32   : > { %p697_p11 = pnand %p696_p3, %p690_p9 }
  0x34   : > { %700 = shalt.err (!%p697_p11)
}
  0x35   : > { %536 = dma.hbm_to_vmem [thread:$0]  (!%p976_p13), %s1196_s1, 128, %s125_s29, [#allocation7]  }
  0x36   : > { %p29_p1 = scmp.ge.s32.totalorder %s28_s3, 5  ;;  %s31_s5 = sadd.s32 1, %s853_s18 }
  0x37   : > { %s38_s6 = sadd.s32 1, %s837_s14  ;;  %p45_p3 = scmp.ne.s32.totalorder %s837_s14, %s833_s13 }
  0x38   : > { %s1219_s3 = smov (%p29_p1, %s28_s3), 0  ;;  %s1221_s5 = smov (!%p29_p1, %s31_s5), %s853_s18 }
  0x39   : > { %1197 = sst [smem:[#allocation14_spill]] %s1219_s3  ;;  %p46_p7 = scmp.eq.s32.totalorder %s857_s19, 0 }
  0x3a   : > { %s83_s30 = ssub.s32 %s849_s17, %s1219_s3  ;;  %p33_p9 = scmp.ge.s32.totalorder %s1221_s5, 2 }
  0x3b   : > { %p546_p11 = scmp.lt.s32.totalorder %s857_s19, 10  ;;  %p1008_p0 = por %p46_p7, %p45_p3 }
  0x3c   : > { %s135_s29 = sand.u32 1, %s837_s14   ;;  %s1223_s5 = smov (%p33_p9, %s1221_s5), 0 }
  0x3d   : > { %1199 = sst [smem:[#allocation15_spill]] %s1223_s5  ;;  %s521_s8 = smul.u32 40, %s135_s29 }
  0x3e   : > { %s35_s12 = ssub.s32 %s853_s18, %s1223_s5  ;;  %s522_s20 = smul.u32 640, %s853_s18 }
  0x3f   : > { %p36_p13 = scmp.eq.s32.totalorder %s35_s12, 0  ;;  %s84_s21 = sor.u32 %s83_s30, %s35_s12 }
  0x40   : > { %p85_p2 = scmp.eq.s32.totalorder %s84_s21, 0  ;;  %s1029_s17 = scalar_lea.hbm %s1175_s0, %s522_s20 }
  0x41   : > { %s1019_s28 = scalar_select %p36_p13, %s837_s14, %s38_s6  }
  0x42   : > { %s1024_s4 = scalar_select %p85_p2, %s825_s11, %s87_s23  }
  0x43   : > { %s139_s26 = scalar_lea.vmem [#allocation3], %s521_s8  ;;  %p1037_p4 = pnand %p546_p11, %p1008_p0 }
  0x44   : > { %s147_s5 = sshll.u32 %s139_s26, 4  ;;  %s136_s23 = scalar_lea.sflag [#allocation4], %s135_s29  ;;  %s1031_s5 = int_to_ptr.vmem [resolvable:$true] %s147_s5 }
  0x45   : > { %s701_s1 = scalar_lea.hbm %s1029_s17, 640  ;;  %p703_p6 = pneg %p1037_p4 }
  0x46   : > { %p702_p5 = scmp.ne.s32.totalorder %s1029_s17, %s701_s1  ;;  %s706_s30 = scalar_lea.hbm %s1175_s0, 1280 }
  0x47   : > { %p707_p12 = scmp.lt.u32.totalorder %s1029_s17, %s1175_s0  ;;  %p708_p1 = scmp.lt.u32.totalorder %s706_s30, %s701_s1 }
  0x48   : > { %p704_p8 = pnand %p703_p6, %p702_p5  ;;  %p710_p7 = scmp.lt.u32.totalorder %s701_s1, %s1029_s17 }
  0x49   : > { %p709_p3 = por %p708_p1, %p707_p12 }
  0x4a   : > { %p705_p10 = pneg %p704_p8 }
  0x4b   : > { %p711_p9 = por %p710_p7, %p709_p3 }
  0x4d   : > { %p712_p11 = pnand %p711_p9, %p705_p10 }
  0x4f   : > { %715 = shalt.err (!%p712_p11)
}
  0x50   : > { %s716_s29 = scalar_lea.vmem %s1031_s5, 640  ;;  %s860_s12 = smov [#allocation3]  }
  0x51   : > { %p717_p0 = scmp.ne.s32.totalorder %s1031_s5, %s716_s29  ;;  %s721_s20 = sshll.u32 %s860_s12, 4  ;;  %s722_s20 = int_to_ptr.vmem [resolvable:$false] %s721_s20 }
  0x52   : > { %s723_s21 = scalar_lea.vmem %s722_s20, 1280  ;;  %p724_p5 = scmp.lt.s32.totalorder %s1031_s5, %s722_s20 }
  0x53   : > { %p719_p13 = pnand %p717_p0, %p703_p6  ;;  %p725_p8 = scmp.lt.s32.totalorder %s723_s21, %s716_s29 }
  0x55   : > { %p720_p2 = pneg %p719_p13  ;;  %p726_p12 = por %p725_p8, %p724_p5 }
  0x57   : > { %p727_p1 = pnand %p726_p12, %p720_p2 }
  0x59   : > { %730 = shalt.err (!%p727_p1)
}
  0x5a   : > { %540 = dma.hbm_to_vmem [thread:$0]  (!%p1037_p4), %s1029_s17, 640, %s1031_s5, %s136_s23  }
  0x5b   : > { %p1201_p10 = scmp.ne.s32.totalorder %s1194_s27, 0 }
  0x5c   : > { %s158_s1 = sand.u32 (!%p1201_p10), 1, %s833_s13   ;;  %p1202_p6 = scmp.ne.s32.totalorder (!%p1201_p10), %s1190_s24, 0 }
  0x5d   : > { %156 = sbr.rel (%p1201_p10) target bundleno = 621 (0x26d), region = 28  ;;  %s159_s3 = scalar_lea.sflag (!%p1201_p10), [#allocation4], %s158_s1 }
  0x5e   : > { %s523_s26 = smul.u32 (!%p1201_p10), 40, %s158_s1 }
  0x60   : > { %s1069_s30 = scalar_lea.vmem (!%p1201_p10), [#allocation3], %s523_s26 }
  0x64   : > { %804 = dma.done.wait (%p1202_p6), %s159_s3, 640  }
  0x65   : > { %806 = vsyncadd (%p1202_p6), %s159_s3, 4294966656  ;;  %p1203_p3 = scmp.ne.s32.totalorder %s1189_s22, 0 }
  0x67   : > { %808 = dma.done.wait (%p1203_p3), [#allocation7], 128  }
  0x68   : > { %810 = vsyncadd (%p1203_p3), [#allocation7], 4294967168  ;;  %s184_s17 = sand.u32 1, %s821_s10   ;;  %s1081_s27 = sshll.u32 %s841_s15, 7 }
  0x69   : > { %s1085_s5 = sshll.u32 %s184_s17, 3  ;;  %s188_s24 = sshra.s32 %s1081_s27, 7 }
  0x6a   : > { %s483_s6 = sshll.u32 %s188_s24, 3  ;;  %s186_s7 = scalar_lea.vmem [#allocation8], %s1085_s5 }
  0x6b   : > { %s191_s23 = scalar_lea.vmem %s1069_s30, %s483_s6 [#allocation3]  ;;  %p484_p4 = scmp.ne.s32.totalorder %s841_s15, 0 }
  0x6c   : > { %v192_v0 = vld [vmem:[%s191_s23] sm:$0xff]  ;;  %v861_v1 = vmov (!%p484_p4), 0.0  }
  0x6d   : > { %193 = vst [vmem:[#allocation2 + $0x8] sm:$0xff] %v192_v0  ;;  %197 = sbr.rel (%p484_p4) target bundleno = 116 (0x74), region = 40  ;;  %198 = vst [vmem:[#allocation2] sm:$0xff] (!%p484_p4), %v861_v1 }
  0x74 PF: > { %p485_p7 = scmp.le.s32.totalorder %s841_s15, 0 }
  0x75   : > { %s486_s22 = sadd.s32 (!%p485_p7), 4294967168, %s1081_s27 }
  0x76   : > { %202 = sbr.rel (%p485_p7) target bundleno = 125 (0x7d), region = 44  ;;  %s204_s8 = sshra.s32 (!%p485_p7), %s486_s22, 7 }
  0x77   : > { %s487_s29 = sshll.u32 (!%p485_p7), %s204_s8, 3 }
  0x78   : > { %s207_s12 = scalar_lea.vmem (!%p485_p7), %s1069_s30, %s487_s29 [#allocation3] }
  0x79   : > { %v208_v2 = vld [vmem:[%s207_s12] sm:$0xff] (!%p485_p7) }
  0x7a   : > { %209 = vst [vmem:[#allocation2] sm:$0xff] (!%p485_p7), %v208_v2 }
  0x7d PF: > { %p488_p9 = scmp.ne.s32.totalorder %s841_s15, 4 }
  0x7e   : > { %v862_v3 = vmov (!%p488_p9), 0.0  }
  0x7f   : > { %213 = sbr.rel (%p488_p9) target bundleno = 134 (0x86), region = 48  ;;  %214 = vst [vmem:[#allocation2 + $0x10] sm:$0xff] (!%p488_p9), %v862_v3 }
  0x86 PF: > { %p489_p11 = scmp.ge.s32.totalorder %s841_s15, 4 }
  0x87   : > { %s219_s20 = sadd.s32 (!%p489_p11), 128, %s1081_s27 }
  0x88   : > { %218 = sbr.rel (%p489_p11) target bundleno = 143 (0x8f), region = 52  ;;  %s220_s21 = sshra.s32 (!%p489_p11), %s219_s20, 7 }
  0x89   : > { %s490_s1 = sshll.u32 (!%p489_p11), %s220_s21, 3 }
  0x8a   : > { %s223_s26 = scalar_lea.vmem (!%p489_p11), %s1069_s30, %s490_s1 [#allocation3] }
  0x8b   : > { %v224_v4 = vld [vmem:[%s223_s26] sm:$0xff] (!%p489_p11) }
  0x8c   : > { %225 = vst [vmem:[#allocation2 + $0x10] sm:$0xff] (!%p489_p11), %v224_v4 }
  0x8f PF: > { %v226_v5 = vld [vmem:[#allocation2] sm:$0xff]  ;;  %v227_v6 = vld [vmem:[#allocation2 + $0x8] sm:$0xff]  ;;  %s863_s3 = smov 126   ;;  %s864_s24 = smov 127   ;;  %v868_v10 = vmov 0.0|0.0   ;;  %vm236_vm0 = vcmask 1039360  }
  0x90   : > { %v658_v8 = vpack.i.bf16 %v227_v6, %v226_v5  ;;  %238 = vrot.lane.b32.xlu1 %v227_v6, %s863_s3  ;;  %s865_s6 = smov 124   ;;  %s866_s23 = smov 125   ;;  %515 = vmatprep.subr.bf16.mxu0 %v868_v10  ;;  %vm246_vm1 = vcmask 1022976   ;;  %vm869_vm2 = vmmov 0   ;;  %v870_v20 = vmov 0.0   ;;  %v254_v44 = vld [vmem:[#allocation6] sm:$0xff] }
  0x91   : > { %s867_s27 = smov 2   ;;  %512 = vmatprep.mubr.msk.f32.mxu0 %vm869_vm2, %v870_v20  ;;  %vm252_vm3 = vcmask 1014784   ;;  %vm273_vm4 = vcmask 15360   ;;  %vm283_vm5 = vcmask 326656   ;;  %s524_s30 = smul.u32 5, %s845_s16 }
  0x92   : > { %649 = vrot.lane.b32.xlu0 %v658_v8, %s864_s24  ;;  %s374_s29 = sshll.u32 %s186_s7, 4  ;;  %s359_s16 = scalar_lea.sflag [#allocation5], %s184_s17  ;;  %s1111_s29 = int_to_ptr.vmem [resolvable:$true] %s374_s29 }
  0x93   : > { %v229_v7 = vld [vmem:[#allocation2 + $0x10] sm:$0xff]  ;;  %s370_s22 = sadd.s32 %s841_s15, %s524_s30  ;;  %s731_s15 = scalar_lea.vmem %s1111_s29, 128 }
  0x94   : > { %v653_v9 = vpack.i.bf16 %v229_v7, %v227_v6  ;;  %248 = vrot.lane.b32.xlu1 %v227_v6, %s865_s6  ;;  %s493_s8 = sshll.u32 %s370_s22, 7  ;;  %p732_p0 = scmp.ne.s32.totalorder %s1111_s29, %s731_s15 }
  0x95   : > { %s1109_s21 = scalar_lea.hbm %s1177_s2, %s493_s8  ;;  %p1204_p13 = scmp.ne.s32.totalorder %s1191_s25, 0 }
  0x96   : > { %654 = vrot.lane.b32.xlu0 %v653_v9, %s866_s23  ;;  %s871_s1 = smov [#allocation8]  }
  0x97   : > { %p733_p2 = pnand %p732_p0, %p1204_p13  ;;  %s735_s26 = sshll.u32 %s871_s1, 4  ;;  %s736_s26 = int_to_ptr.vmem [resolvable:$false] %s735_s26 }
  0x98   : > { %659 = vrot.lane.b32.xlu1 %v658_v8, %s867_s27  ;;  %s737_s3 = scalar_lea.vmem %s736_s26, 256  ;;  %p738_p8 = scmp.lt.s32.totalorder %s1111_s29, %s736_s26 }
  0x99   : > { %p734_p5 = pneg %p733_p2  ;;  %p739_p12 = scmp.lt.s32.totalorder %s737_s3, %s731_s15 }
  0x9a   : > { %250 = vrot.lane.b32.xlu0 %v229_v7, %s865_s6 }
  0x9b   : > { %p740_p1 = por %p739_p12, %p738_p8 }
  0x9d   : > { %p741_p10 = pnand %p740_p1, %p734_p5 }
 0x102   : > { %v239_v14 = vpop.permute.xlu1 %238 }
 0x104   : > { %v650_v11 = vpop.permute.xlu0 %649 }
 0x105   : > { %v652_v12 = vunpack.i.h.bf16 %v650_v11  ;;  %v651_v13 = vunpack.i.l.bf16 %v650_v11 }
 0x106   : > { %v249_v23 = vpop.permute.xlu1 %248 }
 0x107   : > { %v237_v15 = vsel %vm236_vm0, %v651_v13, %v652_v12 }
 0x108   : > { %v663_v16 = vpack.i.bf16 %v652_v12, %v237_v15  ;;  %v655_v17 = vpop.permute.xlu0 %654 }
 0x109   : > { %v657_v18 = vunpack.i.h.bf16 %v655_v17  ;;  %v656_v19 = vunpack.i.l.bf16 %v655_v17 }
 0x10a   : > { %664 = vrot.lane.b32.xlu0 %v663_v16, %s867_s27  ;;  %v660_v26 = vpop.permute.xlu1 %659 }
 0x10b   : > { %v247_v21 = vsel %vm246_vm1, %v656_v19, %v657_v18  ;;  %v662_v27 = vunpack.i.h.bf16 %v660_v26  ;;  %v661_v28 = vunpack.i.l.bf16 %v660_v26 }
 0x10c   : > { %v668_v22 = vpack.i.bf16 %v247_v21, %v656_v19  ;;  %v251_v24 = vpop.permute.xlu0 %250 }
 0x10d   : > { %v253_v25 = vsel %vm252_vm3, %v249_v23, %v251_v24  ;;  %v274_v32 = vsel %vm273_vm4, %v661_v28, %v662_v27 }
 0x10e   : > { %669 = vrot.lane.b32.xlu1 %v668_v22, %s867_s27  ;;  %263 = vrot.lane.b32.xlu0 %v239_v14, %s867_s27 }
 0x112   : > { %269 = vrot.lane.b32.xlu1 %v249_v23, %s867_s27  ;;  %271 = vrot.lane.b32.xlu0 %v253_v25, %s867_s27 }
 0x17c   : > { %v665_v29 = vpop.permute.xlu0 %664 }
 0x17d   : > { %v667_v30 = vunpack.i.h.bf16 %v665_v29  ;;  %v666_v31 = vunpack.i.l.bf16 %v665_v29 }
 0x17f   : > { %v275_v33 = vsel %vm273_vm4, %v666_v31, %v667_v30 }
 0x180   : > { %v670_v34 = vpop.permute.xlu1 %669  ;;  %v516_v35 = vpack.c.bf16 %v275_v33, %v274_v32  ;;  %v264_v36 = vpop.permute.xlu0 %263 }
 0x181   : > { %v672_v37 = vunpack.i.h.bf16 %v670_v34  ;;  %v671_v38 = vunpack.i.l.bf16 %v670_v34 }
 0x182   : > { %517 = vmatpush3.bf16.msra.mxu0 %v516_v35 }
 0x183   : > { %v276_v39 = vsel %vm273_vm4, %v671_v38, %v672_v37  ;;  %518 = vmatprep.subr.bf16.mxu0 %v868_v10 }
 0x184   : > { %v519_v40 = vpack.c.bf16 %v276_v39, %v264_v36  ;;  %v270_v41 = vpop.permute.xlu1 %269  ;;  %v272_v42 = vpop.permute.xlu0 %271 }
 0x185   : > { %v277_v43 = vsel %vm273_vm4, %v270_v41, %v272_v42 }
 0x186   : > { %520 = vmatpush3.bf16.msra.mxu0 %v519_v40 }
 0x187   : > { %510 = vmatprep.subr.mxu0 %v870_v20 }
 0x18a   : > { %511 = vmatpush3.msra.mxu0 %v277_v43 }
 0x18b   : > { %513 = vmatmul.mubr.msk.f32.vlgmr.msra.gmra.mrb[0].mxu0 %vm283_vm5, %v254_v44 }
 0x25e   : > { %v353_v45 = vpop.f32.mrb[0].mxu0 }
 0x25f   : > { %357 = vst [vmem:[%s186_s7] sm:$0xff] %v353_v45  ;;  %v514_v46 = vpop.f32.mrb[1].mxu0 }
 0x260   : > { %744 = shalt.err (!%p741_p10)
}
 0x261   : > { %s745_s17 = scalar_lea.hbm %s1109_s21, 128  ;;  %s749_s24 = scalar_lea.hbm %s1177_s2, 1280 }
 0x262   : > { %p746_p6 = scmp.ne.s32.totalorder %s1109_s21, %s745_s17  ;;  %p750_p7 = scmp.lt.u32.totalorder %s1109_s21, %s1177_s2 }
 0x263   : > { %p751_p9 = scmp.lt.u32.totalorder %s749_s24, %s745_s17  ;;  %p753_p0 = scmp.lt.u32.totalorder %s745_s17, %s1109_s21 }
 0x264   : > { %p747_p3 = pnand %p746_p6, %p1204_p13 }
 0x265   : > { %p752_p11 = por %p751_p9, %p750_p7 }
 0x266   : > { %p748_p4 = pneg %p747_p3 }
 0x267   : > { %p754_p2 = por %p753_p0, %p752_p11 }
 0x269   : > { %p755_p5 = pnand %p754_p2, %p748_p4 }
 0x26b   : > { %758 = shalt.err (!%p755_p5)
}
 0x26c   : > { %531 = dma.vmem_to_hbm [thread:$0]  (%p1204_p13), %s1111_s29, 128, %s1109_s21, %s359_s16  }
 0x26d PF: > { %s1205_s27 = sld [smem:[#allocation13_spill]]  ;;  %p548_p8 = scmp.ge.s32.totalorder %s857_s19, 2 }
 0x26e   : > { %s386_s30 = sand.u32 1, %s817_s9  }
 0x26f   : > { %s387_s22 = scalar_lea.sflag [#allocation5], %s386_s30 }
 0x273   : > { %p1206_p12 = scmp.ne.s32.totalorder %s1205_s27, 0 }
 0x275   : > { %p542_p1 = pnand %p548_p8, %p1206_p12 }
 0x277   : > { %812 = dma.done.wait (!%p542_p1), %s387_s22, 128  }
 0x278   : > { %814 = vsyncadd (!%p542_p1), %s387_s22, 4294967168  ;;  %s19_s19 = sadd.s32 1, %s857_s19   ;;  %s1207_s15 = sld [smem:[#allocation12_spill]] }
 0x279   : > { %p16_p10 = scmp.ge.s32.totalorder %s19_s19, 12   ;;  %s1208_s17 = sld [smem:[#allocation14_spill]] }
 0x27a   : > { %s1209_s25 = sld [smem:[#allocation15_spill]]  ;;  %s1210_s9 = smov %s821_s10 }
 0x27b   : > { %s1211_s10 = smov %s825_s11  ;;  %s1212_s11 = smov %s1024_s4 }
 0x27c   : > { %s1213_s12 = smov %s833_s13  ;;  %s1214_s13 = smov %s837_s14 }
 0x27d   : > { %s1215_s14 = smov %s1019_s28  ;;  %s1216_s16 = smov %s853_s18 }
 0x27e   :  { %18 = sbr.rel (!%p16_p10) target bundleno = 12 (0xc), region = 96 }
 0x280   : > { %s1217_s18 = smov %s1209_s25 }
 0x285   :  { %392 = vsyncpa [#allocation4], 1 }
 0x286   :  { %394 = vsyncpa [#allocation4 + $0x1], 1 }
 0x287   :  { %395 = vsyncpa [#allocation7], 1 }
 0x288   :  { %396 = vsyncpa [#allocation5], 1 }
 0x289   :  { %398 = vsyncpa [#allocation5 + $0x1], 1 }

</bundles_post_ra>
